<compile_context>
chip_gen: v7x
topology: tpu7x:2x2x1
jax: 0.10.0
libtpu: 0.0.40
codegen_flags: <defaults>
</compile_context>

<pallas_src>
import functools

import jax
import jax.numpy as jnp
from jax.experimental import pallas as pl
from jax.experimental.pallas import tpu as pltpu


def _round_up(x, m):
    return (x + m - 1) // m * m


def _classifier_kernel(num_ref, cls_ref,
                       w1_ref, w2_ref, w3c_ref, w3n_ref, w4_ref,
                       bias_ref, out_ref):
    # Packed biases (f32), tile-aligned static lane slices.
    b1 = bias_ref[:, 0:128]      # numerical_layer[0] bias (128)
    b2 = bias_ref[:, 128:256]    # numerical_layer[3] bias (64, zero-padded to 128)
    b3 = bias_ref[:, 256:512]    # classifier[0] bias (256)
    b4 = bias_ref[:, 512:640]    # classifier[3] bias (3, zero-padded to 128)

    # numerical_layer: Linear -> ReLU -> (Dropout: eval identity) -> Linear
    h1 = jnp.dot(num_ref[...], w1_ref[...],
                 preferred_element_type=jnp.float32) + b1
    h1 = jnp.maximum(h1, 0.0)                                   # ReLU in f32
    num_out = jnp.dot(h1.astype(jnp.bfloat16), w2_ref[...],
                      preferred_element_type=jnp.float32) + b2  # (TB, 128), cols 64: are 0

    # classifier on concat([cls, num_out]) == split-weight matmuls (exact)
    z = (jnp.dot(cls_ref[...], w3c_ref[...], preferred_element_type=jnp.float32)
         + jnp.dot(num_out.astype(jnp.bfloat16), w3n_ref[...],
                   preferred_element_type=jnp.float32)
         + b3)
    z = jnp.maximum(z, 0.0)                                     # ReLU in f32
    logits = jnp.dot(z.astype(jnp.bfloat16), w4_ref[...],
                     preferred_element_type=jnp.float32) + b4   # (TB, 128), cols 3: are 0
    out_ref[...] = logits.astype(out_ref.dtype)


@jax.jit
def sentiment_classifier_forward(numerical_features, cls_hidden, params):
    """Returns logits of shape (B, 3)."""
    (w1, w2, w3c, w3n, w4, bias_pack) = params   # padded + bf16-cast at init
    B, F = numerical_features.shape
    H = cls_hidden.shape[1]
    F_pad = w1.shape[0]
    H_pad = w3c.shape[0]

    # Batch tile: multiple of the (8, 128) sublane tiling; 128 for large batches.
    TB = min(128, _round_up(B, 8))
    B_pad = _round_up(B, TB)
    grid = (pl.cdiv(B_pad, TB),)

    # Zero-pad batch and feature dims; cast matmul operands to bf16.
    num = jnp.zeros((B_pad, F_pad), jnp.bfloat16)
    num = num.at[:B, :F].set(numerical_features.astype(jnp.bfloat16))
    cls = jnp.zeros((B_pad, H_pad), jnp.bfloat16)
    cls = cls.at[:B, :H].set(cls_hidden.astype(jnp.bfloat16))

    args = (num, cls, w1, w2, w3c, w3n, w4, bias_pack)

    flops = 2 * B_pad * (F_pad * 128 + 128 * 128 + H_pad * 256 + 128 * 256 + 256 * 128)
    bytes_accessed = sum(int(a.size) * a.dtype.itemsize for a in args) \
        + B_pad * 128 * 4

    def _batched(shape):
        # activation / output blocks: tiled along the batch axis
        return pl.BlockSpec((TB, shape[1]), lambda i: (i, 0))

    def _resident(shape):
        # weights / biases: one block, constant index_map -> stays in VMEM
        return pl.BlockSpec(shape, lambda i: (0, 0))

    out = pl.pallas_call(
        _classifier_kernel,
        out_shape=jax.ShapeDtypeStruct((B_pad, 128), jnp.float32),
        grid=grid,
        in_specs=[
            _batched(num.shape),
            _batched(cls.shape),
            _resident(w1.shape),
            _resident(w2.shape),
            _resident(w3c.shape),
            _resident(w3n.shape),
            _resident(w4.shape),
            _resident(bias_pack.shape),
        ],
        out_specs=pl.BlockSpec((TB, 128), lambda i: (i, 0)),
        compiler_params=pltpu.CompilerParams(
            dimension_semantics=("parallel",)),
        cost_estimate=pl.CostEstimate(
            flops=flops, transcendentals=0, bytes_accessed=bytes_accessed),
    )(*args)

    # Drop batch padding and the zero lane-padding of the 3-way logits.
    return out[:B, :3]


def init_params(key, num_numerical_features, hidden_size):
    """nn.Linear-style init (uniform +-1/sqrt(fan_in)), then pad/pack/cast."""
    def linear(k, fan_in, fan_out):
        k_w, k_b = jax.random.split(k)
        bound = 1.0 / jnp.sqrt(fan_in)
        w = jax.random.uniform(k_w, (fan_in, fan_out), jnp.float32, -bound, bound)
        b = jax.random.uniform(k_b, (fan_out,), jnp.float32, -bound, bound)
        return w, b

    k1, k2, k3, k4 = jax.random.split(key, 4)
    w1, b1 = linear(k1, num_numerical_features, 128)   # numerical_layer[0]
    w2, b2 = linear(k2, 128, 64)                       # numerical_layer[3]
    w3, b3 = linear(k3, hidden_size + 64, 256)         # classifier[0]
    w4, b4 = linear(k4, 256, 3)                        # classifier[3]

    # Split classifier[0] weight at the real hidden_size for the concat-free kernel.
    w3c = w3[:hidden_size, :]
    w3n = w3[hidden_size:, :]

    F_pad = _round_up(num_numerical_features, 128)
    H_pad = _round_up(hidden_size, 128)

    # Zero-pad to lane-friendly sizes (math-exact: zero rows/cols contribute 0).
    w1p = jnp.zeros((F_pad, 128), jnp.float32).at[:num_numerical_features, :].set(w1)
    w2p = jnp.zeros((128, 128), jnp.float32).at[:, :64].set(w2)
    w3cp = jnp.zeros((H_pad, 256), jnp.float32).at[:hidden_size, :].set(w3c)
    w3np = jnp.zeros((128, 256), jnp.float32).at[:64, :].set(w3n)
    w4p = jnp.zeros((256, 128), jnp.float32).at[:, :3].set(w4)

    # Pack biases into one (1, 640) f32 array: [b1 | b2 | b3 | b4], 128/128/256/128 lanes.
    bias_pack = jnp.zeros((1, 640), jnp.float32)
    bias_pack = bias_pack.at[0, 0:128].set(b1)
    bias_pack = bias_pack.at[0, 128:128 + 64].set(b2)
    bias_pack = bias_pack.at[0, 256:512].set(b3)
    bias_pack = bias_pack.at[0, 512:512 + 3].set(b4)

    return (w1p.astype(jnp.bfloat16), w2p.astype(jnp.bfloat16),
            w3cp.astype(jnp.bfloat16), w3np.astype(jnp.bfloat16),
            w4p.astype(jnp.bfloat16), bias_pack)


def cross_entropy_loss(logits, labels):
    # Plain-JAX glue (matches nn.CrossEntropyLoss mean reduction).
    logp = jax.nn.log_softmax(logits, axis=-1)
    nll = -jnp.take_along_axis(logp, labels[:, None], axis=-1)[:, 0]
    return jnp.mean(nll)


if __name__ == "__main__":
    # Small shapes consistent with the module's forward.
    B = 8                      # batch
    NUM_FEATS = 32             # num_numerical_features (small stand-in for 1006)
    HIDDEN = 64                # bert hidden_size (small stand-in for 768)

    key = jax.random.PRNGKey(0)
    k_num, k_cls, k_lbl, k_par = jax.random.split(key, 4)

    numerical_features = jax.random.normal(k_num, (B, NUM_FEATS), jnp.float32)
    cls_hidden = jax.random.normal(k_cls, (B, HIDDEN), jnp.float32)
    labels = jax.random.randint(k_lbl, (B,), 0, 3)

    params = init_params(k_par, NUM_FEATS, HIDDEN)

    logits = sentiment_classifier_forward(numerical_features, cls_hidden, params)
    logits = jax.block_until_ready(logits)
    loss = jax.block_until_ready(cross_entropy_loss(logits, labels))

    assert logits.shape == (B, 3)
    assert bool(jnp.all(jnp.isfinite(logits)))
    assert jnp.isfinite(loss)
    print("KERNEL_OK")
</pallas_src>

<mosaic_0001>
module attributes {stable_mosaic.version = 11 : i64} {
  func.func @_classifier_kernel(%arg0: i32, %arg1: memref<8x128xbf16, #tpu.memory_space<vmem>>, %arg2: memref<8x128xbf16, #tpu.memory_space<vmem>>, %arg3: memref<128x128xbf16, #tpu.memory_space<vmem>>, %arg4: memref<128x128xbf16, #tpu.memory_space<vmem>>, %arg5: memref<128x256xbf16, #tpu.memory_space<vmem>>, %arg6: memref<128x256xbf16, #tpu.memory_space<vmem>>, %arg7: memref<256x128xbf16, #tpu.memory_space<vmem>>, %arg8: memref<1x640xf32, #tpu.memory_space<vmem>>, %arg9: memref<8x128xf32, #tpu.memory_space<vmem>>) attributes {dimension_semantics = [#tpu.dimension_semantics<parallel>], iteration_bounds = array<i64: 1>, scalar_prefetch = 0 : i64, scratch_operands = 0 : i64, tpu.core_type = #tpu.core_type<tc>, window_params = [{transform_indices = @transform_0, window_bounds = array<i64: 8, 128>}, {transform_indices = @transform_1, window_bounds = array<i64: 8, 128>}, {pipeline_mode = #tpu.pipeline_mode<synchronous>, transform_indices = @transform_2, window_bounds = array<i64: 128, 128>}, {pipeline_mode = #tpu.pipeline_mode<synchronous>, transform_indices = @transform_3, window_bounds = array<i64: 128, 128>}, {pipeline_mode = #tpu.pipeline_mode<synchronous>, transform_indices = @transform_4, window_bounds = array<i64: 128, 256>}, {pipeline_mode = #tpu.pipeline_mode<synchronous>, transform_indices = @transform_5, window_bounds = array<i64: 128, 256>}, {pipeline_mode = #tpu.pipeline_mode<synchronous>, transform_indices = @transform_6, window_bounds = array<i64: 256, 128>}, {pipeline_mode = #tpu.pipeline_mode<synchronous>, transform_indices = @transform_7, window_bounds = array<i64: 1, 640>}, {transform_indices = @transform_8, window_bounds = array<i64: 8, 128>}]} {
    %c0 = arith.constant 0 : index
    %c0_0 = arith.constant 0 : index
    %0 = vector.load %arg8[%c0, %c0_0] : memref<1x640xf32, #tpu.memory_space<vmem>>, vector<1x128xf32>
    %c0_1 = arith.constant 0 : index
    %c128 = arith.constant 128 : index
    %1 = vector.load %arg8[%c0_1, %c128] : memref<1x640xf32, #tpu.memory_space<vmem>>, vector<1x128xf32>
    %c0_2 = arith.constant 0 : index
    %c256 = arith.constant 256 : index
    %2 = vector.load %arg8[%c0_2, %c256] : memref<1x640xf32, #tpu.memory_space<vmem>>, vector<1x256xf32>
    %c0_3 = arith.constant 0 : index
    %c512 = arith.constant 512 : index
    %3 = vector.load %arg8[%c0_3, %c512] : memref<1x640xf32, #tpu.memory_space<vmem>>, vector<1x128xf32>
    %c0_4 = arith.constant 0 : index
    %c0_5 = arith.constant 0 : index
    %4 = vector.load %arg1[%c0_4, %c0_5] : memref<8x128xbf16, #tpu.memory_space<vmem>>, vector<8x128xbf16>
    %c0_6 = arith.constant 0 : index
    %c0_7 = arith.constant 0 : index
    %5 = vector.load %arg3[%c0_6, %c0_7] : memref<128x128xbf16, #tpu.memory_space<vmem>>, vector<128x128xbf16>
    %cst = arith.constant dense<0.000000e+00> : vector<8x128xf32>
    %6 = tpu.matmul %4, %5, %cst {dimension_numbers = #tpu.dot_dimension_numbers<[1], [0], [0], [1], [0, 0, 1, 1], [], []>} : vector<8x128xbf16>, vector<128x128xbf16>, vector<8x128xf32> -> vector<8x128xf32>
    %7 = vector.broadcast %0 : vector<1x128xf32> to vector<8x128xf32>
    %8 = arith.addf %6, %7 : vector<8x128xf32>
    %cst_8 = arith.constant 0.000000e+00 : f32
    %9 = vector.broadcast %cst_8 : f32 to vector<8x128xf32>
    %10 = arith.maximumf %8, %9 : vector<8x128xf32>
    %11 = arith.truncf %10 : vector<8x128xf32> to vector<8x128xbf16>
    %c0_9 = arith.constant 0 : index
    %c0_10 = arith.constant 0 : index
    %12 = vector.load %arg4[%c0_9, %c0_10] : memref<128x128xbf16, #tpu.memory_space<vmem>>, vector<128x128xbf16>
    %cst_11 = arith.constant dense<0.000000e+00> : vector<8x128xf32>
    %13 = tpu.matmul %11, %12, %cst_11 {dimension_numbers = #tpu.dot_dimension_numbers<[1], [0], [0], [1], [0, 0, 1, 1], [], []>} : vector<8x128xbf16>, vector<128x128xbf16>, vector<8x128xf32> -> vector<8x128xf32>
    %14 = vector.broadcast %1 : vector<1x128xf32> to vector<8x128xf32>
    %15 = arith.addf %13, %14 : vector<8x128xf32>
    %c0_12 = arith.constant 0 : index
    %c0_13 = arith.constant 0 : index
    %16 = vector.load %arg2[%c0_12, %c0_13] : memref<8x128xbf16, #tpu.memory_space<vmem>>, vector<8x128xbf16>
    %c0_14 = arith.constant 0 : index
    %c0_15 = arith.constant 0 : index
    %17 = vector.load %arg5[%c0_14, %c0_15] : memref<128x256xbf16, #tpu.memory_space<vmem>>, vector<128x256xbf16>
    %cst_16 = arith.constant dense<0.000000e+00> : vector<8x256xf32>
    %18 = tpu.matmul %16, %17, %cst_16 {dimension_numbers = #tpu.dot_dimension_numbers<[1], [0], [0], [1], [0, 0, 1, 1], [], []>} : vector<8x128xbf16>, vector<128x256xbf16>, vector<8x256xf32> -> vector<8x256xf32>
    %19 = arith.truncf %15 : vector<8x128xf32> to vector<8x128xbf16>
    %c0_17 = arith.constant 0 : index
    %c0_18 = arith.constant 0 : index
    %20 = vector.load %arg6[%c0_17, %c0_18] : memref<128x256xbf16, #tpu.memory_space<vmem>>, vector<128x256xbf16>
    %cst_19 = arith.constant dense<0.000000e+00> : vector<8x256xf32>
    %21 = tpu.matmul %19, %20, %cst_19 {dimension_numbers = #tpu.dot_dimension_numbers<[1], [0], [0], [1], [0, 0, 1, 1], [], []>} : vector<8x128xbf16>, vector<128x256xbf16>, vector<8x256xf32> -> vector<8x256xf32>
    %22 = arith.addf %18, %21 : vector<8x256xf32>
    %23 = vector.broadcast %2 : vector<1x256xf32> to vector<8x256xf32>
    %24 = arith.addf %22, %23 : vector<8x256xf32>
    %cst_20 = arith.constant 0.000000e+00 : f32
    %25 = vector.broadcast %cst_20 : f32 to vector<8x256xf32>
    %26 = arith.maximumf %24, %25 : vector<8x256xf32>
    %27 = arith.truncf %26 : vector<8x256xf32> to vector<8x256xbf16>
    %c0_21 = arith.constant 0 : index
    %c0_22 = arith.constant 0 : index
    %28 = vector.load %arg7[%c0_21, %c0_22] : memref<256x128xbf16, #tpu.memory_space<vmem>>, vector<256x128xbf16>
    %cst_23 = arith.constant dense<0.000000e+00> : vector<8x128xf32>
    %29 = tpu.matmul %27, %28, %cst_23 {dimension_numbers = #tpu.dot_dimension_numbers<[1], [0], [0], [1], [0, 0, 1, 1], [], []>} : vector<8x256xbf16>, vector<256x128xbf16>, vector<8x128xf32> -> vector<8x128xf32>
    %30 = vector.broadcast %3 : vector<1x128xf32> to vector<8x128xf32>
    %31 = arith.addf %29, %30 : vector<8x128xf32>
    %c0_24 = arith.constant 0 : index
    %c0_25 = arith.constant 0 : index
    %32 = vector.load %arg9[%c0_24, %c0_25] : memref<8x128xf32, #tpu.memory_space<vmem>>, vector<8x128xf32>
    tpu.vector_store %arg9[%c0_24, %c0_25], %31 {strides = array<i32>} : memref<8x128xf32, #tpu.memory_space<vmem>>, vector<8x128xf32>,
    return
  }
  func.func @transform_0(%arg0: i32) -> (i32, i32) {
    %c0_i32 = arith.constant 0 : i32
    %c0_i32_0 = arith.constant 0 : i32
    return %arg0, %c0_i32 : i32, i32
  }
  func.func @transform_1(%arg0: i32) -> (i32, i32) {
    %c0_i32 = arith.constant 0 : i32
    %c0_i32_0 = arith.constant 0 : i32
    return %arg0, %c0_i32 : i32, i32
  }
  func.func @transform_2(%arg0: i32) -> (i32, i32) {
    %c0_i32 = arith.constant 0 : i32
    %c0_i32_0 = arith.constant 0 : i32
    %c0_i32_1 = arith.constant 0 : i32
    return %c0_i32, %c0_i32_0 : i32, i32
  }
  func.func @transform_3(%arg0: i32) -> (i32, i32) {
    %c0_i32 = arith.constant 0 : i32
    %c0_i32_0 = arith.constant 0 : i32
    %c0_i32_1 = arith.constant 0 : i32
    return %c0_i32, %c0_i32_0 : i32, i32
  }
  func.func @transform_4(%arg0: i32) -> (i32, i32) {
    %c0_i32 = arith.constant 0 : i32
    %c0_i32_0 = arith.constant 0 : i32
    %c0_i32_1 = arith.constant 0 : i32
    return %c0_i32, %c0_i32_0 : i32, i32
  }
  func.func @transform_5(%arg0: i32) -> (i32, i32) {
    %c0_i32 = arith.constant 0 : i32
    %c0_i32_0 = arith.constant 0 : i32
    %c0_i32_1 = arith.constant 0 : i32
    return %c0_i32, %c0_i32_0 : i32, i32
  }
  func.func @transform_6(%arg0: i32) -> (i32, i32) {
    %c0_i32 = arith.constant 0 : i32
    %c0_i32_0 = arith.constant 0 : i32
    %c0_i32_1 = arith.constant 0 : i32
    return %c0_i32, %c0_i32_0 : i32, i32
  }
  func.func @transform_7(%arg0: i32) -> (i32, i32) {
    %c0_i32 = arith.constant 0 : i32
    %c0_i32_0 = arith.constant 0 : i32
    %c0_i32_1 = arith.constant 0 : i32
    return %c0_i32, %c0_i32_0 : i32, i32
  }
  func.func @transform_8(%arg0: i32) -> (i32, i32) {
    %c0_i32 = arith.constant 0 : i32
    %c0_i32_0 = arith.constant 0 : i32
    return %arg0, %c0_i32 : i32, i32
  }
}

</mosaic_0001>

<bundles_post_ra>
// kernel: sentiment_classifier_forward.1
= control target key start
LH: loop header
LB: loop body
LE: loop exit
PB: predicated region body
PF: predicated region fallthrough
CT: control target
= control target key end

     0   :  { %13 = vsyncpa [#allocation3], 0  ;;  %s1308_s0 = inlined_call_operand.vmem [shape: bf16[8,128], index: 0, kind: input, shape index: {}]   ;;  %s1309_s1 = inlined_call_operand.vmem [shape: bf16[8,128], index: 1, kind: input, shape index: {}]   ;;  %s1310_s2 = inlined_call_operand.hbm [shape: bf16[128,128], index: 2, kind: input, shape index: {}]   ;;  %s1311_s3 = inlined_call_operand.hbm [shape: bf16[128,128], index: 3, kind: input, shape index: {}]   ;;  %s1312_s4 = inlined_call_operand.hbm [shape: bf16[128,256], index: 4, kind: input, shape index: {}]   ;;  %s1313_s5 = inlined_call_operand.hbm [shape: bf16[128,256], index: 5, kind: input, shape index: {}]   ;;  %s1314_s6 = inlined_call_operand.hbm [shape: bf16[256,128], index: 6, kind: input, shape index: {}]   ;;  %s1315_s7 = inlined_call_operand.vmem [shape: f32[1,640], index: 7, kind: input, shape index: {}]   ;;  %s1316_s8 = inlined_call_operand.vmem [shape: f32[8,128], index: 8, kind: output, shape index: {}]  }
   0x1   :  { %14 = vsyncpa [#allocation5], 0 }
   0x2   :  { %15 = vsyncpa [#allocation8], 0  ;;  %s1155_s27 = smov [#allocation4]   ;;  %s1039_s9 = scalar_lea.hbm %s1311_s3, 1024 }
   0x3   :  { %s37_s28 = sshll.u32 %s1155_s27, 4  ;;  %p1040_p0 = scmp.ne.s32.totalorder %s1311_s3, %s1039_s9  ;;  %s38_s28 = int_to_ptr.vmem [resolvable:$true] %s37_s28 }
   0x4   :  { %p1043_p1 = scmp.lt.u32.totalorder %s1039_s9, %s1311_s3 }
   0x6   :  { %p1045_p2 = pnand %p1043_p1, %p1040_p0 }
   0x8   :  { %1048 = shalt.err (!%p1045_p2)
}
   0x9   :  { %s1049_s14 = scalar_lea.vmem %s38_s28, 1024  ;;  %p1054_p4 = scmp.lt.s32.totalorder %s38_s28, %s38_s28 }
   0xa   :  { %p1050_p3 = scmp.ne.s32.totalorder %s38_s28, %s1049_s14  ;;  %p1055_p5 = scmp.lt.s32.totalorder %s1049_s14, %s1049_s14 }
   0xc   :  { %p1056_p6 = por %p1055_p5, %p1054_p4 }
   0xe   :  { %p1057_p7 = pnand %p1056_p6, %p1050_p3 }
  0x10   :  { %1060 = shalt.err (!%p1057_p7)
}
  0x11   :  { %s1156_s15 = smov 64   ;;  %s1157_s16 = smov 4  }
  0x12   :  { %43 = dma.hbm_to_vmem [thread:$0]  %s1311_s3, 1024, %s38_s28, [#allocation5], %s1156_s15, %s1156_s15, %s1157_s16  }
  0x13   :  { %s1158_s19 = smov [#allocation7]   ;;  %s1159_s21 = smov [#allocation2]  }
  0x14   :  { %s61_s20 = sshll.u32 %s1158_s19, 4  ;;  %s25_s22 = sshll.u32 %s1159_s21, 4  ;;  %s62_s20 = int_to_ptr.vmem [resolvable:$true] %s61_s20  ;;  %s26_s22 = int_to_ptr.vmem [resolvable:$true] %s25_s22 }
  0x15   :  { %s1061_s25 = scalar_lea.hbm %s1313_s5, 2048 }
  0x16   :  { %p1062_p8 = scmp.ne.s32.totalorder %s1313_s5, %s1061_s25  ;;  %p1065_p9 = scmp.lt.u32.totalorder %s1061_s25, %s1313_s5 }
  0x18   :  { %p1067_p10 = pnand %p1065_p9, %p1062_p8 }
  0x1a   :  { %1070 = shalt.err (!%p1067_p10)
}
  0x1b   :  { %s1071_s3 = scalar_lea.vmem %s62_s20, 2048  ;;  %p1076_p12 = scmp.lt.s32.totalorder %s62_s20, %s62_s20 }
  0x1c   :  { %p1072_p11 = scmp.ne.s32.totalorder %s62_s20, %s1071_s3  ;;  %p1077_p13 = scmp.lt.s32.totalorder %s1071_s3, %s1071_s3 }
  0x1e   :  { %p1078_p0 = por %p1077_p13, %p1076_p12 }
  0x20   :  { %p1079_p1 = pnand %p1078_p0, %p1072_p11 }
  0x22   :  { %1082 = shalt.err (!%p1079_p1)
}
  0x23   :  { %s1160_s28 = smov 128   ;;  %s1161_s9 = smov 8  }
  0x24   :  { %67 = dma.hbm_to_vmem [thread:$0]  %s1313_s5, 2048, %s62_s20, [#allocation8], %s1160_s28, %s1160_s28, %s1161_s9  }
  0x25   :  { %s1083_s14 = scalar_lea.hbm %s1310_s2, 1024 }
  0x26   :  { %p1084_p2 = scmp.ne.s32.totalorder %s1310_s2, %s1083_s14  ;;  %p1087_p3 = scmp.lt.u32.totalorder %s1083_s14, %s1310_s2 }
  0x28   :  { %p1089_p4 = pnand %p1087_p3, %p1084_p2 }
  0x2a   :  { %1092 = shalt.err (!%p1089_p4)
}
  0x2b   :  { %s1093_s23 = scalar_lea.vmem %s26_s22, 1024  ;;  %p1098_p6 = scmp.lt.s32.totalorder %s26_s22, %s26_s22 }
  0x2c   :  { %p1094_p5 = scmp.ne.s32.totalorder %s26_s22, %s1093_s23  ;;  %p1099_p7 = scmp.lt.s32.totalorder %s1093_s23, %s1093_s23 }
  0x2e   :  { %p1100_p8 = por %p1099_p7, %p1098_p6 }
  0x30   :  { %p1101_p9 = pnand %p1100_p8, %p1094_p5 }
  0x32   :  { %1104 = shalt.err (!%p1101_p9)
}
  0x33   :  { %31 = dma.hbm_to_vmem [thread:$0]  %s1310_s2, 1024, %s26_s22, [#allocation3], %s1156_s15, %s1156_s15, %s1157_s16  }
  0x34   :  { %s1162_s24 = smov [#allocation6]   ;;  %s1163_s26 = smov [#allocation9]  }
  0x35   :  { %s49_s25 = sshll.u32 %s1162_s24, 4  ;;  %s73_s27 = sshll.u32 %s1163_s26, 4  ;;  %s50_s25 = int_to_ptr.vmem [resolvable:$true] %s49_s25  ;;  %s74_s27 = int_to_ptr.vmem [resolvable:$true] %s73_s27 }
  0x36   :  { %s1105_s3 = scalar_lea.hbm %s1312_s4, 2048 }
  0x37   :  { %p1106_p10 = scmp.ne.s32.totalorder %s1312_s4, %s1105_s3  ;;  %p1109_p11 = scmp.lt.u32.totalorder %s1105_s3, %s1312_s4 }
  0x39   :  { %p1111_p12 = pnand %p1109_p11, %p1106_p10 }
  0x3b   :  { %1114 = shalt.err (!%p1111_p12)
}
  0x3c   :  { %s1115_s2 = scalar_lea.vmem %s50_s25, 2048  ;;  %p1120_p0 = scmp.lt.s32.totalorder %s50_s25, %s50_s25 }
  0x3d   :  { %p1116_p13 = scmp.ne.s32.totalorder %s50_s25, %s1115_s2  ;;  %p1121_p1 = scmp.lt.s32.totalorder %s1115_s2, %s1115_s2 }
  0x3f   :  { %p1122_p2 = por %p1121_p1, %p1120_p0 }
  0x41   :  { %p1123_p3 = pnand %p1122_p2, %p1116_p13 }
  0x43   :  { %1126 = shalt.err (!%p1123_p3)
}
  0x44   :  { %55 = dma.hbm_to_vmem [thread:$0]  %s1312_s4, 2048, %s50_s25, [#allocation5], %s1160_s28, %s1160_s28, %s1161_s9  }
  0x45   :  { %s1127_s19 = scalar_lea.hbm %s1314_s6, 2048 }
  0x46   :  { %p1128_p4 = scmp.ne.s32.totalorder %s1314_s6, %s1127_s19  ;;  %p1131_p5 = scmp.lt.u32.totalorder %s1127_s19, %s1314_s6 }
  0x48   :  { %p1133_p6 = pnand %p1131_p5, %p1128_p4 }
  0x4a   :  { %1136 = shalt.err (!%p1133_p6)
}
  0x4b   :  { %s1137_s24 = scalar_lea.vmem %s74_s27, 2048  ;;  %p1142_p8 = scmp.lt.s32.totalorder %s74_s27, %s74_s27 }
  0x4c   :  { %p1138_p7 = scmp.ne.s32.totalorder %s74_s27, %s1137_s24  ;;  %p1143_p9 = scmp.lt.s32.totalorder %s1137_s24, %s1137_s24 }
  0x4e   :  { %p1144_p10 = por %p1143_p9, %p1142_p8 }
  0x50   :  { %p1145_p11 = pnand %p1144_p10, %p1138_p7 }
  0x52   :  { %1148 = shalt.err (!%p1145_p11)
}
  0x53   :  { %79 = dma.hbm_to_vmem [thread:$0]  %s1314_s6, 2048, %s74_s27, [#allocation8], %s1156_s15, %s1156_s15, %s1157_s16  }
  0x54   :  { %1149 = dma.done.wait [#allocation3], 1024  }
  0x55   :  { %1150 = vsyncadd [#allocation3], 4294966272 }
  0x56   :  { %1151 = dma.done.wait [#allocation5], 3072  }
  0x57   :  { %1152 = vsyncadd [#allocation5], 4294964224 }
  0x58   :  { %1153 = dma.done.wait [#allocation8], 4096  }
  0x59   :  { %1154 = vsyncadd [#allocation8], 4294963200  ;;  %v1164_v0 = vmov 0.0   ;;  %vm1165_vm0 = vmmov 0   ;;  %v959_v1 = vld [vmem:[#allocation2] sm:$0xff]   ;;  %v960_v2 = vld [vmem:[#allocation2 + $0x8] sm:$0xff]  }
  0x5a   :  { %907 = vmatprep.subr.bf16.mxu0 %v1164_v0  ;;  %923 = vmatprep.mubr.msk.bf16.mxu0 %vm1165_vm0, %v1164_v0  ;;  %v961_v3 = vld [vmem:[#allocation2 + $0x10] sm:$0xff]   ;;  %v967_v4 = vld [vmem:[#allocation4] sm:$0xff]   ;;  %v962_v5 = vld [vmem:[#allocation2 + $0x18] sm:$0xff]   ;;  %v1166_v58 = vmov 0  }
  0x5b   :  { %927 = vmatprep.subr.bf16.mxu1 %v1164_v0  ;;  %943 = vmatprep.mubr.msk.bf16.mxu1 %vm1165_vm0, %v1164_v0  ;;  %v968_v6 = vld [vmem:[#allocation4 + $0x8] sm:$0xff]   ;;  %v963_v7 = vld [vmem:[#allocation2 + $0x20] sm:$0xff]   ;;  %v969_v8 = vld [vmem:[#allocation4 + $0x10] sm:$0xff]  }
  0x5c   :  { %908 = vmatpush3.bf16.msra.mxu0 %v959_v1  ;;  %928 = vmatpush3.bf16.msra.mxu1 %v967_v4  ;;  %v964_v9 = vld [vmem:[#allocation2 + $0x28] sm:$0xff]   ;;  %v970_v10 = vld [vmem:[#allocation4 + $0x18] sm:$0xff]   ;;  %v965_v11 = vld [vmem:[#allocation2 + $0x30] sm:$0xff]  }
  0x5d   :  { %909 = vmatprep.subr.bf16.mxu0 %v1164_v0  ;;  %929 = vmatprep.subr.bf16.mxu1 %v1164_v0  ;;  %v971_v12 = vld [vmem:[#allocation4 + $0x20] sm:$0xff]   ;;  %v966_v13 = vld [vmem:[#allocation2 + $0x38] sm:$0xff]   ;;  %v972_v14 = vld [vmem:[#allocation4 + $0x28] sm:$0xff]  }
  0x5e   :  { %v102_v15 = vld [vmem:[%s1308_s0] sm:$0xf]  ;;  %v973_v16 = vld [vmem:[#allocation4 + $0x30] sm:$0xff]   ;;  %v974_v17 = vld [vmem:[#allocation4 + $0x38] sm:$0xff]  }
  0x5f   :  { %v977_v18 = vld [vmem:[#allocation6 + $0x4] ss:$8 sps:$4 sm:$0xff]   ;;  %v978_v19 = vld [vmem:[#allocation7] ss:$8 sps:$4 sm:$0xff]   ;;  %v984_v21 = vld [vmem:[#allocation7 + $0x10] ss:$8 sps:$4 sm:$0xff]  }
  0x60   :  { %910 = vmatpush3.bf16.msra.mxu0 %v960_v2  ;;  %930 = vmatpush3.bf16.msra.mxu1 %v968_v6  ;;  %v980_v20 = vld [vmem:[#allocation7 + $0x4] ss:$8 sps:$4 sm:$0xff]   ;;  %v986_v22 = vld [vmem:[#allocation7 + $0x14] ss:$8 sps:$4 sm:$0xff]   ;;  %v990_v23 = vld [vmem:[#allocation7 + $0x20] ss:$8 sps:$4 sm:$0xff]  }
  0x61   :  { %911 = vmatprep.subr.bf16.mxu0 %v1164_v0  ;;  %931 = vmatprep.subr.bf16.mxu1 %v1164_v0  ;;  %v992_v24 = vld [vmem:[#allocation7 + $0x24] ss:$8 sps:$4 sm:$0xff]   ;;  %v996_v25 = vld [vmem:[#allocation7 + $0x30] ss:$8 sps:$4 sm:$0xff]   ;;  %v998_v26 = vld [vmem:[#allocation7 + $0x34] ss:$8 sps:$4 sm:$0xff]  }
  0x62   :  { %v1002_v27 = vld [vmem:[#allocation7 + $0x40] ss:$8 sps:$4 sm:$0xff]   ;;  %v1004_v28 = vld [vmem:[#allocation7 + $0x44] ss:$8 sps:$4 sm:$0xff]   ;;  %v1008_v29 = vld [vmem:[#allocation7 + $0x50] ss:$8 sps:$4 sm:$0xff]  }
  0x63   :  { %v1010_v30 = vld [vmem:[#allocation7 + $0x54] ss:$8 sps:$4 sm:$0xff]   ;;  %v1014_v31 = vld [vmem:[#allocation7 + $0x60] ss:$8 sps:$4 sm:$0xff]   ;;  %v1016_v32 = vld [vmem:[#allocation7 + $0x64] ss:$8 sps:$4 sm:$0xff]  }
  0x64   :  { %912 = vmatpush3.bf16.msra.mxu0 %v961_v3  ;;  %932 = vmatpush3.bf16.msra.mxu1 %v969_v8  ;;  %v800_v33 = vld [vmem:[%s1315_s7] ss:$0 sm:$0xff]  ;;  %v983_v42 = vld [vmem:[#allocation6 + $0x14] ss:$8 sps:$4 sm:$0xff]   ;;  %v981_v43 = vld [vmem:[#allocation6 + $0x10] ss:$8 sps:$4 sm:$0xff]  }
  0x65   :  { %913 = vmatprep.subr.bf16.mxu0 %v1164_v0  ;;  %933 = vmatprep.subr.bf16.mxu1 %v1164_v0  ;;  %v975_v40 = vld [vmem:[#allocation6] ss:$8 sps:$4 sm:$0xff]   ;;  %v989_v44 = vld [vmem:[#allocation6 + $0x24] ss:$8 sps:$4 sm:$0xff]   ;;  %v995_v46 = vld [vmem:[#allocation6 + $0x34] ss:$8 sps:$4 sm:$0xff]  }
  0x66   :  { %v987_v45 = vld [vmem:[#allocation6 + $0x20] ss:$8 sps:$4 sm:$0xff]   ;;  %v993_v47 = vld [vmem:[#allocation6 + $0x30] ss:$8 sps:$4 sm:$0xff]   ;;  %v1001_v48 = vld [vmem:[#allocation6 + $0x44] ss:$8 sps:$4 sm:$0xff]  }
  0x67   :  { %v999_v49 = vld [vmem:[#allocation6 + $0x40] ss:$8 sps:$4 sm:$0xff]   ;;  %v1007_v50 = vld [vmem:[#allocation6 + $0x54] ss:$8 sps:$4 sm:$0xff]   ;;  %v1005_v51 = vld [vmem:[#allocation6 + $0x50] ss:$8 sps:$4 sm:$0xff]  }
  0x68   :  { %914 = vmatpush3.bf16.msra.mxu0 %v962_v5  ;;  %934 = vmatpush3.bf16.msra.mxu1 %v970_v10  ;;  %v1013_v52 = vld [vmem:[#allocation6 + $0x64] ss:$8 sps:$4 sm:$0xff]   ;;  %v1011_v53 = vld [vmem:[#allocation6 + $0x60] ss:$8 sps:$4 sm:$0xff]   ;;  %v1019_v54 = vld [vmem:[#allocation6 + $0x74] ss:$8 sps:$4 sm:$0xff]  }
  0x69   :  { %915 = vmatprep.subr.bf16.mxu0 %v1164_v0  ;;  %935 = vmatprep.subr.bf16.mxu1 %v1164_v0  ;;  %v1017_v55 = vld [vmem:[#allocation6 + $0x70] ss:$8 sps:$4 sm:$0xff]   ;;  %v1022_v56 = vld [vmem:[#allocation7 + $0x74] ss:$8 sps:$4 sm:$0xff]   ;;  %v325_v59 = vld [vmem:[%s1309_s1] sm:$0xf] }
  0x6a   :  { %v1020_v57 = vld [vmem:[#allocation7 + $0x70] ss:$8 sps:$4 sm:$0xff]   ;;  %v1023_v60 = vld [vmem:[#allocation9 + $0x40] sm:$0xff]   ;;  %v1025_v5 = vld [vmem:[#allocation9 + $0x48] sm:$0xff]  }
  0x6b   :  { %v809_v61 = vld [vmem:[%s1315_s7 + $0x1] ss:$0 sm:$0xff]  ;;  %v1026_v6 = vld [vmem:[#allocation9 + $0x8] sm:$0xff]   ;;  %v1028_v8 = vld [vmem:[#allocation9 + $0x10] sm:$0xff]  }
  0x6c   :  { %916 = vmatpush3.bf16.msra.mxu0 %v963_v7  ;;  %936 = vmatpush3.bf16.msra.mxu1 %v971_v12  ;;  %v1024_v2 = vld [vmem:[#allocation9] sm:$0xff]   ;;  %v1027_v7 = vld [vmem:[#allocation9 + $0x50] sm:$0xff]   ;;  %v1030_v10 = vld [vmem:[#allocation9 + $0x18] sm:$0xff]  }
  0x6d   :  { %917 = vmatprep.subr.bf16.mxu0 %v1164_v0  ;;  %937 = vmatprep.subr.bf16.mxu1 %v1164_v0  ;;  %v1032_v12 = vld [vmem:[#allocation9 + $0x20] sm:$0xff]  }
  0x70   :  { %918 = vmatpush3.bf16.msra.mxu0 %v964_v9  ;;  %938 = vmatpush3.bf16.msra.mxu1 %v972_v14  ;;  %v1029_v9 = vld [vmem:[#allocation9 + $0x58] sm:$0xff]  }
  0x71   :  { %919 = vmatprep.subr.bf16.mxu0 %v1164_v0  ;;  %939 = vmatprep.subr.bf16.mxu1 %v1164_v0 }
  0x74   :  { %920 = vmatpush3.bf16.msra.mxu0 %v965_v11  ;;  %940 = vmatpush3.bf16.msra.mxu1 %v973_v16  ;;  %v1031_v11 = vld [vmem:[#allocation9 + $0x60] sm:$0xff]   ;;  %v1034_v16 = vld [vmem:[#allocation9 + $0x28] sm:$0xff]  }
  0x75   :  { %921 = vmatprep.subr.bf16.mxu0 %v1164_v0  ;;  %941 = vmatprep.subr.bf16.mxu1 %v1164_v0 }
  0x78   :  { %922 = vmatpush3.bf16.msra.mxu0 %v966_v13  ;;  %942 = vmatpush3.bf16.msra.mxu1 %v974_v17  ;;  %v1033_v13 = vld [vmem:[#allocation9 + $0x68] sm:$0xff]  }
  0x79   :  { %560 = vmatprep.subr.bf16.mxu1 %v977_v18  ;;  %439 = vmatprep.subr.bf16.mxu0 %v980_v20  ;;  %v1036_v20 = vld [vmem:[#allocation9 + $0x30] sm:$0xff]  }
  0x7b   :  { %924 = vmatmul.mubr.bf16.vlgmr.msra.gmra.mrb[0].mxu0 %v102_v15 }
  0x7c   :  { %440 = vmatpush1.bf16.msra.mxu0 %v978_v19  ;;  %471 = vmatprep.mubr.bf16.mxu0 %v1166_v58  ;;  %v1035_v19 = vld [vmem:[#allocation9 + $0x70] sm:$0xff]  }
  0x7d   :  { %441 = vmatprep.subr.bf16.mxu0 %v986_v22  ;;  %v1038_v22 = vld [vmem:[#allocation9 + $0x38] sm:$0xff]  }
  0x80   :  { %442 = vmatpush1.bf16.msra.mxu0 %v984_v21  ;;  %v1037_v21 = vld [vmem:[#allocation9 + $0x78] sm:$0xff]  }
  0x81   :  { %443 = vmatprep.subr.bf16.mxu0 %v992_v24 }
  0x84   :  { %444 = vmatpush1.bf16.msra.mxu0 %v990_v23  ;;  %v602_v23 = vlaneseq }
  0x85   :  { %445 = vmatprep.subr.bf16.mxu0 %v998_v26  ;;  %v100_v26 = vld [vmem:[%s1315_s7 + $0x2] sm:$0x3] }
  0x86   :  { %v603_v24 = vshrl.u32 %v602_v23, 7 }
  0x88   :  { %446 = vmatpush1.bf16.msra.mxu0 %v996_v25  ;;  %v604_v25 = vsub.s32 0, %v603_v24 }
  0x89   :  { %447 = vmatprep.subr.bf16.mxu0 %v1004_v28 }
  0x8a   :  { %v605_v28 = vrot.slane %v100_v26, %v604_v25 }
  0x8c   :  { %448 = vmatpush1.bf16.msra.mxu0 %v1002_v27  ;;  %v608_v27 = vsub.s32 1, %v603_v24 }
  0x8d   :  { %449 = vmatprep.subr.bf16.mxu0 %v1010_v30 }
  0x8e   :  { %v609_v30 = vrot.slane %v100_v26, %v608_v27 }
  0x90   :  { %450 = vmatpush1.bf16.msra.mxu0 %v1008_v29 }
  0x91   :  { %451 = vmatprep.subr.bf16.mxu0 %v1016_v32 }
  0x94   :  { %452 = vmatpush1.bf16.msra.mxu0 %v1014_v31 }
  0x95   :  { %453 = vmatprep.subr.bf16.mxu0 %v1022_v56 }
  0x98   :  { %454 = vmatpush1.bf16.msra.mxu0 %v1020_v57 }
  0x99   :  { %885 = vmatprep.subr.bf16.mxu0 %v1023_v60 }
 0x14e   :  { %v207_v34 = vpop.f32.mrb[0].mxu0 }
 0x14f   :  { %v208_v35 = vadd.f32 %v800_v33, %v207_v34  ;;  %v925_v36 = vpop.f32.mrb[1].mxu0 }
 0x150   :  { %v210_v37 = vpop.f32.mrb[2].mxu0 }
 0x151   :  { %v213_v38 = vmax.f32 %v208_v35, 0.0  ;;  %v926_v39 = vpop.f32.mrb[3].mxu0 }
 0x153   :  { %v214_v41 = vpack.c.bf16 %v213_v38, %v213_v38 }
 0x155   :  { %944 = vmatmul.mubr.bf16.vlgmr.msra.gmra.mrb[0].mxu1 %v214_v41 }
 0x156   :  { %561 = vmatpush1.bf16.msra.mxu1 %v975_v40  ;;  %592 = vmatprep.mubr.bf16.mxu1 %v1166_v58 }
 0x157   :  { %562 = vmatprep.subr.bf16.mxu1 %v983_v42 }
 0x15a   :  { %563 = vmatpush1.bf16.msra.mxu1 %v981_v43  ;;  %v850_v43 = vld [vmem:[%s1315_s7 + $0x4] ss:$0 sm:$0xff] }
 0x15b   :  { %564 = vmatprep.subr.bf16.mxu1 %v989_v44 }
 0x15e   :  { %565 = vmatpush1.bf16.msra.mxu1 %v987_v45 }
 0x15f   :  { %566 = vmatprep.subr.bf16.mxu1 %v995_v46 }
 0x162   :  { %567 = vmatpush1.bf16.msra.mxu1 %v993_v47 }
 0x163   :  { %568 = vmatprep.subr.bf16.mxu1 %v1001_v48 }
 0x166   :  { %569 = vmatpush1.bf16.msra.mxu1 %v999_v49 }
 0x167   :  { %570 = vmatprep.subr.bf16.mxu1 %v1007_v50 }
 0x16a   :  { %571 = vmatpush1.bf16.msra.mxu1 %v1005_v51 }
 0x16b   :  { %572 = vmatprep.subr.bf16.mxu1 %v1013_v52 }
 0x16e   :  { %573 = vmatpush1.bf16.msra.mxu1 %v1011_v53 }
 0x16f   :  { %574 = vmatprep.subr.bf16.mxu1 %v1019_v54 }
 0x172   :  { %575 = vmatpush1.bf16.msra.mxu1 %v1017_v55 }
 0x175   :  { %593 = vmatmul.mubr.bf16.vlgmr.msra.gmra.mrb[4].mxu1 %v325_v59 }
 0x228   :  { %v319_v62 = vpop.f32.mrb[0].mxu1 }
 0x229   :  { %v320_v63 = vadd.f32 %v809_v61, %v319_v62  ;;  %v945_v0 = vpop.f32.mrb[1].mxu1 }
 0x22a   :  { %v322_v1 = vpop.f32.mrb[2].mxu1 }
 0x22b   :  { %v342_v3 = vpack.c.bf16 %v320_v63, %v320_v63  ;;  %v946_v4 = vpop.f32.mrb[3].mxu1 }
 0x22d   :  { %472 = vmatmul.mubr.bf16.vlgmr.msra.gmra.mrb[4].mxu0 %v342_v3 }
 0x22e   :  { %886 = vmatpush3.bf16.msra.mxu0 %v1024_v2 }
 0x22f   :  { %887 = vmatprep.subr.bf16.mxu0 %v1025_v5 }
 0x232   :  { %888 = vmatpush3.bf16.msra.mxu0 %v1026_v6 }
 0x233   :  { %889 = vmatprep.subr.bf16.mxu0 %v1027_v7 }
 0x236   :  { %890 = vmatpush3.bf16.msra.mxu0 %v1028_v8 }
 0x237   :  { %891 = vmatprep.subr.bf16.mxu0 %v1029_v9 }
 0x23a   :  { %892 = vmatpush3.bf16.msra.mxu0 %v1030_v10 }
 0x23b   :  { %893 = vmatprep.subr.bf16.mxu0 %v1031_v11 }
 0x23e   :  { %894 = vmatpush3.bf16.msra.mxu0 %v1032_v12 }
 0x23f   :  { %895 = vmatprep.subr.bf16.mxu0 %v1033_v13 }
 0x242   :  { %896 = vmatpush3.bf16.msra.mxu0 %v1034_v16 }
 0x243   :  { %897 = vmatprep.subr.bf16.mxu0 %v1035_v19 }
 0x246   :  { %898 = vmatpush3.bf16.msra.mxu0 %v1036_v20 }
 0x247   :  { %899 = vmatprep.subr.bf16.mxu0 %v1037_v21 }
 0x248   :  { %v594_v14 = vpop.f32.mrb[4].mxu1 }
 0x249   :  { %v596_v15 = vpop.f32.mrb[5].mxu1 }
 0x24a   :  { %v598_v17 = vpop.f32.mrb[6].mxu1  ;;  %900 = vmatpush3.bf16.msra.mxu0 %v1038_v22 }
 0x24b   :  { %v599_v18 = vpop.f32.mrb[7].mxu1 }
 0x300   :  { %v473_v29 = vpop.f32.mrb[4].mxu0 }
 0x301   :  { %v595_v31 = vadd.f32 %v594_v14, %v473_v29  ;;  %v475_v32 = vpop.f32.mrb[5].mxu0 }
 0x302   :  { %v597_v33 = vadd.f32 %v596_v15, %v475_v32  ;;  %v477_v34 = vpop.f32.mrb[6].mxu0 }
 0x303   :  { %v612_v35 = vadd.f32 %v605_v28, %v595_v31  ;;  %v478_v36 = vpop.f32.mrb[7].mxu0 }
 0x304   :  { %v613_v37 = vadd.f32 %v609_v30, %v597_v33 }
 0x305   :  { %v614_v38 = vmax.f32 %v612_v35, 0.0 }
 0x306   :  { %v615_v39 = vmax.f32 %v613_v37, 0.0 }
 0x307   :  { %v616_v41 = vpack.c.bf16 %v614_v38, %v614_v38 }
 0x308   :  { %v617_v40 = vpack.c.bf16 %v615_v39, %v615_v39 }
 0x30a   :  { %784 = vmatprep.mubr.bf16.mxu0 %v617_v40 }
 0x30b   :  { %785 = vmatmul.mubr.bf16.vlgmr.msra.gmra.mrb[8].mxu0 %v616_v41 }
 0x3de   :  { %v901_v42 = vpop.f32.mrb[8].mxu0 }
 0x3df   :  { %v902_v44 = vpop.f32.mrb[9].mxu0 }
 0x3e0   :  { %v903_v45 = vadd.f32 %v902_v44, %v901_v42  ;;  %v904_v46 = vpop.f32.mrb[10].mxu0 }
 0x3e1   :  { %v905_v47 = vpop.f32.mrb[11].mxu0 }
 0x3e2   :  { %v787_v48 = vadd.f32 %v903_v45, %v850_v43 }
 0x3e4   :  { %792 = vst [vmem:[%s1316_s8] sm:$0xff] %v787_v48 }
 0x3e5   :  { %797 = vsyncpa [#allocation3], 1 }
 0x3e6   :  { %798 = vsyncpa [#allocation5], 1 }
 0x3e7   :  { %799 = vsyncpa [#allocation8], 1 }

</bundles_post_ra>
